<compile_context>
chip_gen: v5e
topology: v5e:2x2
jax: 0.10.0
libtpu: 0.0.40
codegen_flags: <defaults>
</compile_context>

<pallas_src>
import functools

import numpy as np
import jax
import jax.numpy as jnp
from jax.experimental import pallas as pl
from jax.experimental.pallas import tpu as pltpu


# ----------------------------------------------------------------------------
# pltpu.roll direction probe (run once, eagerly).
#   +1 : pltpu.roll matches jnp.roll  (out[p] = in[(p - shift) % n])
#   -1 : opposite direction           (out[p] = in[(p + shift) % n])
#    0 : unknown -> use slice+concat fallback (always correct)
# ----------------------------------------------------------------------------
_ROLL_SIGN = None


def _get_roll_sign():
    global _ROLL_SIGN
    if _ROLL_SIGN is not None:
        return _ROLL_SIGN
    try:
        def probe(x_ref, o_ref):
            o_ref[...] = pltpu.roll(x_ref[...], shift=1, axis=1)

        x = jax.lax.broadcasted_iota(jnp.float32, (8, 128), 1)
        y = pl.pallas_call(
            probe, out_shape=jax.ShapeDtypeStruct((8, 128), jnp.float32))(x)
        v = float(jax.device_get(y)[0, 0])
        if v == 127.0:
            _ROLL_SIGN = 1
        elif v == 1.0:
            _ROLL_SIGN = -1
        else:
            _ROLL_SIGN = 0
    except Exception:
        _ROLL_SIGN = 0
    return _ROLL_SIGN


def _shift_src(x2, d, hw, roll_sign):
    """Return y with y[:, p] = x2[:, (p + d) % hw]  (circular lane shift)."""
    d = d % hw
    if d == 0:
        return x2
    if roll_sign == 1:          # jnp.roll-like
        return pltpu.roll(x2, shift=hw - d, axis=1)
    if roll_sign == -1:         # opposite convention
        return pltpu.roll(x2, shift=d, axis=1)
    # Fallback: explicit static slices + concat (lane relayout, still correct).
    return jnp.concatenate([x2[:, d:], x2[:, :d]], axis=1)


# ----------------------------------------------------------------------------
# Fused kernel: one grid step processes NB images laid out as (NB, C, H*W).
# ----------------------------------------------------------------------------
def _dwconv_gn_pwconv_kernel(x_ref, w1_ref, b1_ref, mgrp_ref, mask_ref,
                             w2_ref, b2_ref, o_ref, *, taps, W, roll_sign):
    # x_ref   : (NB, C, H*W)   input images (lane-dense)
    # w1_ref  : (C, 9)         depthwise 3x3 weights, row-major taps
    # b1_ref  : (C, 1)         depthwise bias
    # mgrp_ref: (C, C)         group-averaging matrix (1/(cg*HW) within group)
    # mask_ref: (8, H*W)       boundary masks for the 8 non-center taps (f32)
    # w2_ref  : (C_out, C)     1x1 conv weight with GroupNorm gamma folded in
    # b2_ref  : (C_out, 1)     1x1 conv bias with GroupNorm beta folded in
    # o_ref   : (NB, C_out, H*W)
    NB, C, HW = x_ref.shape

    w1 = w1_ref[...].astype(jnp.float32)
    b1 = b1_ref[...].astype(jnp.float32)
    mgrp = mgrp_ref[...].astype(jnp.float32)
    masks = mask_ref[...].astype(jnp.float32)
    w2 = w2_ref[...].astype(jnp.float32)
    b2 = b2_ref[...].astype(jnp.float32)

    for n in range(NB):                          # static unroll (NB small)
        x2 = x_ref[n].astype(jnp.float32)        # (C, HW)

        # --- depthwise 3x3 conv (stride=1, pad=1, groups=C) ---------------
        # center tap (kh=1, kw=1) + 8 shifted, boundary-masked neighbor taps.
        acc = x2 * w1[:, 4:5] + b1               # (C, HW)
        for t, (dh, dw) in enumerate(taps):
            d = dh * W + dw
            shifted = _shift_src(x2, d, HW, roll_sign)     # XLU lane shift
            kidx = (dh + 1) * 3 + (dw + 1)
            acc = acc + shifted * masks[t:t + 1, :] * w1[:, kidx:kidx + 1]

        # --- GroupNorm(4), eps=1e-5: one-pass stats (sum, sum of squares) --
        s1 = jnp.sum(acc, axis=1, keepdims=True)           # (C, 1)
        s2 = jnp.sum(acc * acc, axis=1, keepdims=True)     # (C, 1)
        gm = jnp.dot(mgrp, s1, preferred_element_type=jnp.float32)  # group mean per channel
        gq = jnp.dot(mgrp, s2, preferred_element_type=jnp.float32)  # group E[x^2] per channel
        inv = jax.lax.rsqrt(gq - gm * gm + 1e-5)
        xn = (acc - gm) * inv                              # (C, HW)  (affine folded into w2/b2)

        # --- 1x1 pointwise conv (GN affine pre-folded) ---------------------
        y = jnp.dot(w2, xn, preferred_element_type=jnp.float32) + b2
        o_ref[n] = y.astype(o_ref.dtype)


# ----------------------------------------------------------------------------
# Wrapper
# ----------------------------------------------------------------------------
def depthwise_conv2d_module(x, w1, b1, gamma, beta, w2, b2, *, nb=None):
    """x: (N, C, H, W) f32; w1: (C,3,3); b1,gamma,beta: (C,); w2: (C_out,C); b2: (C_out,).
    Returns (N, C_out, H, W)."""
    N, C, H, W = x.shape
    C_out = w2.shape[0]
    G = 4
    HW = H * W
    assert C % G == 0, "GroupNorm(4) requires C % 4 == 0"

    # Pick images-per-step: batch >=2 images when there are enough to still
    # leave >=2 parallel grid steps (keeps both v7x TensorCores busy).
    if nb is None:
        nb = 2 if (N % 2 == 0 and N >= 4) else 1
    assert N % nb == 0, "batch must be divisible by nb"

    # Loud failure instead of silent VMEM blow-up for large shapes.
    # (Double-buffered in/out blocks + params; budget conservatively for v7x.)
    block_bytes = 4 * (2 * nb * (C + C_out) * HW
                       + C * 9 + C + C * C + 8 * HW + C_out * C + C_out)
    assert block_bytes < 16 * 1024 * 1024, (
        "per-step blocks too large for VMEM; add H-tiling with a 2-row halo")

    # ---- trace-time parameter prep (free under jit) -------------------------
    w1_flat = w1.reshape(C, 9)
    b1_2d = b1.reshape(C, 1)
    # Fold GroupNorm affine into the 1x1 conv.
    w2f = (w2 * gamma[None, :]).astype(jnp.float32)          # (C_out, C)
    b2f = (b2 + w2 @ beta).reshape(C_out, 1).astype(jnp.float32)
    # Group-averaging matrix: gm = mgrp @ per_channel_sums.
    cg = C // G
    grp = np.arange(C) // cg
    mgrp = jnp.asarray(
        (grp[:, None] == grp[None, :]).astype(np.float32) / float(cg * HW))
    # Boundary masks for the 8 non-center taps (also kill circular-wrap lanes).
    taps = [(dh, dw) for dh in (-1, 0, 1) for dw in (-1, 0, 1)
            if not (dh == 0 and dw == 0)]
    rows, cols = np.divmod(np.arange(HW), W)
    masks = jnp.asarray(np.stack(
        [((rows + dh >= 0) & (rows + dh <= H - 1) &
          (cols + dw >= 0) & (cols + dw <= W - 1)).astype(np.float32)
         for (dh, dw) in taps], axis=0))                      # (8, HW)

    x_flat = x.reshape(N, C, HW)                              # contiguous, free
    roll_sign = _get_roll_sign()

    kernel = functools.partial(_dwconv_gn_pwconv_kernel,
                               taps=tuple(taps), W=W, roll_sign=roll_sign)

    out = pl.pallas_call(
        kernel,
        out_shape=jax.ShapeDtypeStruct((N, C_out, HW), x.dtype),
        grid_spec=pltpu.PrefetchScalarGridSpec(
            num_scalar_prefetch=0,
            grid=(N // nb,),
            in_specs=[
                pl.BlockSpec((nb, C, HW), lambda n: (n, 0, 0)),
                pl.BlockSpec((C, 9), lambda n: (0, 0)),
                pl.BlockSpec((C, 1), lambda n: (0, 0)),
                pl.BlockSpec((C, C), lambda n: (0, 0)),
                pl.BlockSpec((8, HW), lambda n: (0, 0)),
                pl.BlockSpec((C_out, C), lambda n: (0, 0)),
                pl.BlockSpec((C_out, 1), lambda n: (0, 0)),
            ],
            out_specs=pl.BlockSpec((nb, C_out, HW), lambda n: (n, 0, 0)),
        ),
        compiler_params=pltpu.CompilerParams(
            dimension_semantics=("parallel",)),
    )(x_flat, w1_flat, b1_2d, mgrp, masks, w2f, b2f)

    return out.reshape(N, C_out, H, W)                        # contiguous, free


# ----------------------------------------------------------------------------
# Plain-JAX reference matching PyTorch semantics.
# ----------------------------------------------------------------------------
def _reference(x, w1, b1, gamma, beta, w2, b2):
    N, C, H, W = x.shape
    C_out = w2.shape[0]
    y = jax.lax.conv_general_dilated(
        x, w1.reshape(C, 1, 3, 3),
        window_strides=(1, 1), padding=((1, 1), (1, 1)),
        dimension_numbers=("NCHW", "OIHW", "NCHW"),
        feature_group_count=C)
    y = y + b1.reshape(1, C, 1, 1)
    G, cg = 4, C // 4
    yg = y.reshape(N, G, cg * H * W)
    mean = jnp.mean(yg, axis=2, keepdims=True)
    var = jnp.var(yg, axis=2, keepdims=True)
    yn = ((yg - mean) / jnp.sqrt(var + 1e-5)).reshape(N, C, H, W)
    yn = yn * gamma.reshape(1, C, 1, 1) + beta.reshape(1, C, 1, 1)
    out = jnp.einsum("oc,nchw->nohw", w2, yn) + b2.reshape(1, C_out, 1, 1)
    return out


if __name__ == "__main__":
    key = jax.random.PRNGKey(0)
    k = jax.random.split(key, 8)

    # N=4 exercises NB=2 images/step while keeping 2 parallel grid steps.
    N, C_in, C_out, H, W = 4, 8, 16, 16, 16

    x = jax.random.normal(k[0], (N, C_in, H, W), jnp.float32)
    w1 = 0.1 * jax.random.normal(k[1], (C_in, 3, 3), jnp.float32)     # conv1 (depthwise)
    b1 = 0.1 * jax.random.normal(k[2], (C_in,), jnp.float32)
    gamma = 1.0 + 0.1 * jax.random.normal(k[3], (C_in,), jnp.float32)  # GroupNorm weight
    beta = 0.1 * jax.random.normal(k[4], (C_in,), jnp.float32)         # GroupNorm bias
    w2 = 0.1 * jax.random.normal(k[5], (C_out, C_in), jnp.float32)     # conv2 (1x1)
    b2 = 0.1 * jax.random.normal(k[6], (C_out,), jnp.float32)

    _get_roll_sign()   # resolve pltpu.roll direction once, eagerly (outside jit)

    fwd = jax.jit(depthwise_conv2d_module)
    out = jax.block_until_ready(fwd(x, w1, b1, gamma, beta, w2, b2))

    ref = _reference(x, w1, b1, gamma, beta, w2, b2)
    assert out.shape == (N, C_out, H, W)
    assert jnp.allclose(out, ref, atol=5e-4, rtol=5e-4), "mismatch vs reference"

    print("KERNEL_OK")
</pallas_src>

<mosaic_0001>
module attributes {stable_mosaic.version = 11 : i64} {
  func.func @probe(%arg0: memref<8x128xf32, #tpu.memory_space<vmem>>, %arg1: memref<8x128xf32, #tpu.memory_space<vmem>>) attributes {dimension_semantics = [], scalar_prefetch = 0 : i64, scratch_operands = 0 : i64, tpu.core_type = #tpu.core_type<tc>} {
    %c0 = arith.constant 0 : index
    %c0_0 = arith.constant 0 : index
    %0 = vector.load %arg0[%c0, %c0_0] : memref<8x128xf32, #tpu.memory_space<vmem>>, vector<8x128xf32>
    %c1_i32 = arith.constant 1 : i32
    %1 = tpu.dynamic_rotate %0 by %c1_i32 dim 1 : vector<8x128xf32>, i32 -> vector<8x128xf32>
    %c0_1 = arith.constant 0 : index
    %c0_2 = arith.constant 0 : index
    %2 = vector.load %arg1[%c0_1, %c0_2] : memref<8x128xf32, #tpu.memory_space<vmem>>, vector<8x128xf32>
    tpu.vector_store %arg1[%c0_1, %c0_2], %1 {strides = array<i32>} : memref<8x128xf32, #tpu.memory_space<vmem>>, vector<8x128xf32>,
    return
  }
}

module attributes {stable_mosaic.version = 11 : i64} {
  func.func @_dwconv_gn_pwconv_kernel(%arg0: i32, %arg1: memref<2x8x256xf32, #tpu.memory_space<vmem>>, %arg2: memref<8x9xf32, #tpu.memory_space<vmem>>, %arg3: memref<8x1xf32, #tpu.memory_space<vmem>>, %arg4: memref<8x8xf32, #tpu.memory_space<vmem>>, %arg5: memref<8x256xf32, #tpu.memory_space<vmem>>, %arg6: memref<16x8xf32, #tpu.memory_space<vmem>>, %arg7: memref<16x1xf32, #tpu.memory_space<vmem>>, %arg8: memref<2x16x256xf32, #tpu.memory_space<vmem>>) attributes {dimension_semantics = [#tpu.dimension_semantics<parallel>], iteration_bounds = array<i64: 2>, scalar_prefetch = 0 : i64, scratch_operands = 0 : i64, tpu.core_type = #tpu.core_type<tc>, window_params = [{transform_indices = @transform_0, window_bounds = array<i64: 2, 8, 256>}, {pipeline_mode = #tpu.pipeline_mode<synchronous>, transform_indices = @transform_1, window_bounds = array<i64: 8, 9>}, {pipeline_mode = #tpu.pipeline_mode<synchronous>, transform_indices = @transform_2, window_bounds = array<i64: 8, 1>}, {pipeline_mode = #tpu.pipeline_mode<synchronous>, transform_indices = @transform_3, window_bounds = array<i64: 8, 8>}, {pipeline_mode = #tpu.pipeline_mode<synchronous>, transform_indices = @transform_4, window_bounds = array<i64: 8, 256>}, {pipeline_mode = #tpu.pipeline_mode<synchronous>, transform_indices = @transform_5, window_bounds = array<i64: 16, 8>}, {pipeline_mode = #tpu.pipeline_mode<synchronous>, transform_indices = @transform_6, window_bounds = array<i64: 16, 1>}, {transform_indices = @transform_7, window_bounds = array<i64: 2, 16, 256>}]} {
    %c0 = arith.constant 0 : index
    %c0_0 = arith.constant 0 : index
    %0 = vector.load %arg2[%c0, %c0_0] : memref<8x9xf32, #tpu.memory_space<vmem>>, vector<8x9xf32>
    %c0_1 = arith.constant 0 : index
    %c0_2 = arith.constant 0 : index
    %1 = vector.load %arg3[%c0_1, %c0_2] : memref<8x1xf32, #tpu.memory_space<vmem>>, vector<8x1xf32>
    %c0_3 = arith.constant 0 : index
    %c0_4 = arith.constant 0 : index
    %2 = vector.load %arg4[%c0_3, %c0_4] : memref<8x8xf32, #tpu.memory_space<vmem>>, vector<8x8xf32>
    %c0_5 = arith.constant 0 : index
    %c0_6 = arith.constant 0 : index
    %3 = vector.load %arg5[%c0_5, %c0_6] : memref<8x256xf32, #tpu.memory_space<vmem>>, vector<8x256xf32>
    %c0_7 = arith.constant 0 : index
    %c0_8 = arith.constant 0 : index
    %4 = vector.load %arg6[%c0_7, %c0_8] : memref<16x8xf32, #tpu.memory_space<vmem>>, vector<16x8xf32>
    %c0_9 = arith.constant 0 : index
    %c0_10 = arith.constant 0 : index
    %5 = vector.load %arg7[%c0_9, %c0_10] : memref<16x1xf32, #tpu.memory_space<vmem>>, vector<16x1xf32>
    %c0_11 = arith.constant 0 : index
    %c0_12 = arith.constant 0 : index
    %c0_13 = arith.constant 0 : index
    %6 = vector.load %arg1[%c0_11, %c0_12, %c0_13] : memref<2x8x256xf32, #tpu.memory_space<vmem>>, vector<1x8x256xf32>
    %7 = vector.shape_cast %6 : vector<1x8x256xf32> to vector<8x256xf32>
    %8 = vector.extract_strided_slice %0 {offsets = [0, 4], sizes = [8, 1], strides = [1, 1]} : vector<8x9xf32> to vector<8x1xf32>
    %9 = vector.broadcast %8 : vector<8x1xf32> to vector<8x256xf32>
    %10 = arith.mulf %7, %9 : vector<8x256xf32>
    %11 = vector.broadcast %1 : vector<8x1xf32> to vector<8x256xf32>
    %12 = arith.addf %10, %11 : vector<8x256xf32>
    %13 = vector.extract_strided_slice %7 {offsets = [0, 239], sizes = [8, 17], strides = [1, 1]} : vector<8x256xf32> to vector<8x17xf32>
    %14 = vector.extract_strided_slice %7 {offsets = [0, 0], sizes = [8, 239], strides = [1, 1]} : vector<8x256xf32> to vector<8x239xf32>
    %15 = tpu.concatenate %13, %14 in 1 : vector<8x17xf32>, vector<8x239xf32> -> vector<8x256xf32>
    %16 = vector.extract_strided_slice %3 {offsets = [0, 0], sizes = [1, 256], strides = [1, 1]} : vector<8x256xf32> to vector<1x256xf32>
    %17 = vector.broadcast %16 : vector<1x256xf32> to vector<8x256xf32>
    %18 = arith.mulf %15, %17 : vector<8x256xf32>
    %19 = vector.extract_strided_slice %0 {offsets = [0, 0], sizes = [8, 1], strides = [1, 1]} : vector<8x9xf32> to vector<8x1xf32>
    %20 = vector.broadcast %19 : vector<8x1xf32> to vector<8x256xf32>
    %21 = arith.mulf %18, %20 : vector<8x256xf32>
    %22 = arith.addf %12, %21 : vector<8x256xf32>
    %23 = vector.extract_strided_slice %7 {offsets = [0, 240], sizes = [8, 16], strides = [1, 1]} : vector<8x256xf32> to vector<8x16xf32>
    %24 = vector.extract_strided_slice %7 {offsets = [0, 0], sizes = [8, 240], strides = [1, 1]} : vector<8x256xf32> to vector<8x240xf32>
    %25 = tpu.concatenate %23, %24 in 1 : vector<8x16xf32>, vector<8x240xf32> -> vector<8x256xf32>
    %26 = vector.extract_strided_slice %3 {offsets = [1, 0], sizes = [1, 256], strides = [1, 1]} : vector<8x256xf32> to vector<1x256xf32>
    %27 = vector.broadcast %26 : vector<1x256xf32> to vector<8x256xf32>
    %28 = arith.mulf %25, %27 : vector<8x256xf32>
    %29 = vector.extract_strided_slice %0 {offsets = [0, 1], sizes = [8, 1], strides = [1, 1]} : vector<8x9xf32> to vector<8x1xf32>
    %30 = vector.broadcast %29 : vector<8x1xf32> to vector<8x256xf32>
    %31 = arith.mulf %28, %30 : vector<8x256xf32>
    %32 = arith.addf %22, %31 : vector<8x256xf32>
    %33 = vector.extract_strided_slice %7 {offsets = [0, 241], sizes = [8, 15], strides = [1, 1]} : vector<8x256xf32> to vector<8x15xf32>
    %34 = vector.extract_strided_slice %7 {offsets = [0, 0], sizes = [8, 241], strides = [1, 1]} : vector<8x256xf32> to vector<8x241xf32>
    %35 = tpu.concatenate %33, %34 in 1 : vector<8x15xf32>, vector<8x241xf32> -> vector<8x256xf32>
    %36 = vector.extract_strided_slice %3 {offsets = [2, 0], sizes = [1, 256], strides = [1, 1]} : vector<8x256xf32> to vector<1x256xf32>
    %37 = vector.broadcast %36 : vector<1x256xf32> to vector<8x256xf32>
    %38 = arith.mulf %35, %37 : vector<8x256xf32>
    %39 = vector.extract_strided_slice %0 {offsets = [0, 2], sizes = [8, 1], strides = [1, 1]} : vector<8x9xf32> to vector<8x1xf32>
    %40 = vector.broadcast %39 : vector<8x1xf32> to vector<8x256xf32>
    %41 = arith.mulf %38, %40 : vector<8x256xf32>
    %42 = arith.addf %32, %41 : vector<8x256xf32>
    %43 = vector.extract_strided_slice %7 {offsets = [0, 255], sizes = [8, 1], strides = [1, 1]} : vector<8x256xf32> to vector<8x1xf32>
    %44 = vector.extract_strided_slice %7 {offsets = [0, 0], sizes = [8, 255], strides = [1, 1]} : vector<8x256xf32> to vector<8x255xf32>
    %45 = tpu.concatenate %43, %44 in 1 : vector<8x1xf32>, vector<8x255xf32> -> vector<8x256xf32>
    %46 = vector.extract_strided_slice %3 {offsets = [3, 0], sizes = [1, 256], strides = [1, 1]} : vector<8x256xf32> to vector<1x256xf32>
    %47 = vector.broadcast %46 : vector<1x256xf32> to vector<8x256xf32>
    %48 = arith.mulf %45, %47 : vector<8x256xf32>
    %49 = vector.extract_strided_slice %0 {offsets = [0, 3], sizes = [8, 1], strides = [1, 1]} : vector<8x9xf32> to vector<8x1xf32>
    %50 = vector.broadcast %49 : vector<8x1xf32> to vector<8x256xf32>
    %51 = arith.mulf %48, %50 : vector<8x256xf32>
    %52 = arith.addf %42, %51 : vector<8x256xf32>
    %53 = vector.extract_strided_slice %7 {offsets = [0, 1], sizes = [8, 255], strides = [1, 1]} : vector<8x256xf32> to vector<8x255xf32>
    %54 = vector.extract_strided_slice %7 {offsets = [0, 0], sizes = [8, 1], strides = [1, 1]} : vector<8x256xf32> to vector<8x1xf32>
    %55 = tpu.concatenate %53, %54 in 1 : vector<8x255xf32>, vector<8x1xf32> -> vector<8x256xf32>
    %56 = vector.extract_strided_slice %3 {offsets = [4, 0], sizes = [1, 256], strides = [1, 1]} : vector<8x256xf32> to vector<1x256xf32>
    %57 = vector.broadcast %56 : vector<1x256xf32> to vector<8x256xf32>
    %58 = arith.mulf %55, %57 : vector<8x256xf32>
    %59 = vector.extract_strided_slice %0 {offsets = [0, 5], sizes = [8, 1], strides = [1, 1]} : vector<8x9xf32> to vector<8x1xf32>
    %60 = vector.broadcast %59 : vector<8x1xf32> to vector<8x256xf32>
    %61 = arith.mulf %58, %60 : vector<8x256xf32>
    %62 = arith.addf %52, %61 : vector<8x256xf32>
    %63 = vector.extract_strided_slice %7 {offsets = [0, 15], sizes = [8, 241], strides = [1, 1]} : vector<8x256xf32> to vector<8x241xf32>
    %64 = vector.extract_strided_slice %7 {offsets = [0, 0], sizes = [8, 15], strides = [1, 1]} : vector<8x256xf32> to vector<8x15xf32>
    %65 = tpu.concatenate %63, %64 in 1 : vector<8x241xf32>, vector<8x15xf32> -> vector<8x256xf32>
    %66 = vector.extract_strided_slice %3 {offsets = [5, 0], sizes = [1, 256], strides = [1, 1]} : vector<8x256xf32> to vector<1x256xf32>
    %67 = vector.broadcast %66 : vector<1x256xf32> to vector<8x256xf32>
    %68 = arith.mulf %65, %67 : vector<8x256xf32>
    %69 = vector.extract_strided_slice %0 {offsets = [0, 6], sizes = [8, 1], strides = [1, 1]} : vector<8x9xf32> to vector<8x1xf32>
    %70 = vector.broadcast %69 : vector<8x1xf32> to vector<8x256xf32>
    %71 = arith.mulf %68, %70 : vector<8x256xf32>
    %72 = arith.addf %62, %71 : vector<8x256xf32>
    %73 = vector.extract_strided_slice %7 {offsets = [0, 16], sizes = [8, 240], strides = [1, 1]} : vector<8x256xf32> to vector<8x240xf32>
    %74 = vector.extract_strided_slice %7 {offsets = [0, 0], sizes = [8, 16], strides = [1, 1]} : vector<8x256xf32> to vector<8x16xf32>
    %75 = tpu.concatenate %73, %74 in 1 : vector<8x240xf32>, vector<8x16xf32> -> vector<8x256xf32>
    %76 = vector.extract_strided_slice %3 {offsets = [6, 0], sizes = [1, 256], strides = [1, 1]} : vector<8x256xf32> to vector<1x256xf32>
    %77 = vector.broadcast %76 : vector<1x256xf32> to vector<8x256xf32>
    %78 = arith.mulf %75, %77 : vector<8x256xf32>
    %79 = vector.extract_strided_slice %0 {offsets = [0, 7], sizes = [8, 1], strides = [1, 1]} : vector<8x9xf32> to vector<8x1xf32>
    %80 = vector.broadcast %79 : vector<8x1xf32> to vector<8x256xf32>
    %81 = arith.mulf %78, %80 : vector<8x256xf32>
    %82 = arith.addf %72, %81 : vector<8x256xf32>
    %83 = vector.extract_strided_slice %7 {offsets = [0, 17], sizes = [8, 239], strides = [1, 1]} : vector<8x256xf32> to vector<8x239xf32>
    %84 = vector.extract_strided_slice %7 {offsets = [0, 0], sizes = [8, 17], strides = [1, 1]} : vector<8x256xf32> to vector<8x17xf32>
    %85 = tpu.concatenate %83, %84 in 1 : vector<8x239xf32>, vector<8x17xf32> -> vector<8x256xf32>
    %86 = vector.extract_strided_slice %3 {offsets = [7, 0], sizes = [1, 256], strides = [1, 1]} : vector<8x256xf32> to vector<1x256xf32>
    %87 = vector.broadcast %86 : vector<1x256xf32> to vector<8x256xf32>
    %88 = arith.mulf %85, %87 : vector<8x256xf32>
    %89 = vector.extract_strided_slice %0 {offsets = [0, 8], sizes = [8, 1], strides = [1, 1]} : vector<8x9xf32> to vector<8x1xf32>
    %90 = vector.broadcast %89 : vector<8x1xf32> to vector<8x256xf32>
    %91 = arith.mulf %88, %90 : vector<8x256xf32>
    %92 = arith.addf %82, %91 : vector<8x256xf32>
    %cst = arith.constant dense<0.000000e+00> : vector<8xf32>
    %93 = vector.multi_reduction <add>, %92, %cst [1] : vector<8x256xf32> to vector<8xf32>
    %94 = vector.shape_cast %93 : vector<8xf32> to vector<8x1xf32>
    %95 = arith.mulf %92, %92 : vector<8x256xf32>
    %cst_14 = arith.constant dense<0.000000e+00> : vector<8xf32>
    %96 = vector.multi_reduction <add>, %95, %cst_14 [1] : vector<8x256xf32> to vector<8xf32>
    %97 = vector.shape_cast %96 : vector<8xf32> to vector<8x1xf32>
    %cst_15 = arith.constant dense<0.000000e+00> : vector<8x1xf32>
    %98 = tpu.matmul %2, %94, %cst_15 {dimension_numbers = #tpu.dot_dimension_numbers<[1], [0], [0], [1], [0, 0, 1, 1], [], []>} : vector<8x8xf32>, vector<8x1xf32>, vector<8x1xf32> -> vector<8x1xf32>
    %cst_16 = arith.constant dense<0.000000e+00> : vector<8x1xf32>
    %99 = tpu.matmul %2, %97, %cst_16 {dimension_numbers = #tpu.dot_dimension_numbers<[1], [0], [0], [1], [0, 0, 1, 1], [], []>} : vector<8x8xf32>, vector<8x1xf32>, vector<8x1xf32> -> vector<8x1xf32>
    %100 = arith.mulf %98, %98 : vector<8x1xf32>
    %101 = arith.subf %99, %100 : vector<8x1xf32>
    %cst_17 = arith.constant 9.99999974E-6 : f32
    %102 = vector.broadcast %cst_17 : f32 to vector<8x1xf32>
    %103 = arith.addf %101, %102 : vector<8x1xf32>
    %104 = math.rsqrt %103 : vector<8x1xf32>
    %105 = vector.broadcast %98 : vector<8x1xf32> to vector<8x256xf32>
    %106 = arith.subf %92, %105 : vector<8x256xf32>
    %107 = vector.broadcast %104 : vector<8x1xf32> to vector<8x256xf32>
    %108 = arith.mulf %106, %107 : vector<8x256xf32>
    %cst_18 = arith.constant dense<0.000000e+00> : vector<16x256xf32>
    %109 = tpu.matmul %4, %108, %cst_18 {dimension_numbers = #tpu.dot_dimension_numbers<[1], [0], [0], [1], [0, 0, 1, 1], [], []>} : vector<16x8xf32>, vector<8x256xf32>, vector<16x256xf32> -> vector<16x256xf32>
    %110 = vector.broadcast %5 : vector<16x1xf32> to vector<16x256xf32>
    %111 = arith.addf %109, %110 : vector<16x256xf32>
    %c0_19 = arith.constant 0 : index
    %c0_20 = arith.constant 0 : index
    %c0_21 = arith.constant 0 : index
    %112 = vector.load %arg8[%c0_19, %c0_20, %c0_21] : memref<2x16x256xf32, #tpu.memory_space<vmem>>, vector<1x16x256xf32>
    %113 = vector.shape_cast %112 : vector<1x16x256xf32> to vector<16x256xf32>
    %114 = vector.shape_cast %111 : vector<16x256xf32> to vector<1x16x256xf32>
    tpu.vector_store %arg8[%c0_19, %c0_20, %c0_21], %114 {strides = array<i32>} : memref<2x16x256xf32, #tpu.memory_space<vmem>>, vector<1x16x256xf32>,
    %c1 = arith.constant 1 : index
    %c0_22 = arith.constant 0 : index
    %c0_23 = arith.constant 0 : index
    %115 = vector.load %arg1[%c1, %c0_22, %c0_23] : memref<2x8x256xf32, #tpu.memory_space<vmem>>, vector<1x8x256xf32>
    %116 = vector.shape_cast %115 : vector<1x8x256xf32> to vector<8x256xf32>
    %117 = vector.extract_strided_slice %0 {offsets = [0, 4], sizes = [8, 1], strides = [1, 1]} : vector<8x9xf32> to vector<8x1xf32>
    %118 = vector.broadcast %117 : vector<8x1xf32> to vector<8x256xf32>
    %119 = arith.mulf %116, %118 : vector<8x256xf32>
    %120 = vector.broadcast %1 : vector<8x1xf32> to vector<8x256xf32>
    %121 = arith.addf %119, %120 : vector<8x256xf32>
    %122 = vector.extract_strided_slice %116 {offsets = [0, 239], sizes = [8, 17], strides = [1, 1]} : vector<8x256xf32> to vector<8x17xf32>
    %123 = vector.extract_strided_slice %116 {offsets = [0, 0], sizes = [8, 239], strides = [1, 1]} : vector<8x256xf32> to vector<8x239xf32>
    %124 = tpu.concatenate %122, %123 in 1 : vector<8x17xf32>, vector<8x239xf32> -> vector<8x256xf32>
    %125 = vector.extract_strided_slice %3 {offsets = [0, 0], sizes = [1, 256], strides = [1, 1]} : vector<8x256xf32> to vector<1x256xf32>
    %126 = vector.broadcast %125 : vector<1x256xf32> to vector<8x256xf32>
    %127 = arith.mulf %124, %126 : vector<8x256xf32>
    %128 = vector.extract_strided_slice %0 {offsets = [0, 0], sizes = [8, 1], strides = [1, 1]} : vector<8x9xf32> to vector<8x1xf32>
    %129 = vector.broadcast %128 : vector<8x1xf32> to vector<8x256xf32>
    %130 = arith.mulf %127, %129 : vector<8x256xf32>
    %131 = arith.addf %121, %130 : vector<8x256xf32>
    %132 = vector.extract_strided_slice %116 {offsets = [0, 240], sizes = [8, 16], strides = [1, 1]} : vector<8x256xf32> to vector<8x16xf32>
    %133 = vector.extract_strided_slice %116 {offsets = [0, 0], sizes = [8, 240], strides = [1, 1]} : vector<8x256xf32> to vector<8x240xf32>
    %134 = tpu.concatenate %132, %133 in 1 : vector<8x16xf32>, vector<8x240xf32> -> vector<8x256xf32>
    %135 = vector.extract_strided_slice %3 {offsets = [1, 0], sizes = [1, 256], strides = [1, 1]} : vector<8x256xf32> to vector<1x256xf32>
    %136 = vector.broadcast %135 : vector<1x256xf32> to vector<8x256xf32>
    %137 = arith.mulf %134, %136 : vector<8x256xf32>
    %138 = vector.extract_strided_slice %0 {offsets = [0, 1], sizes = [8, 1], strides = [1, 1]} : vector<8x9xf32> to vector<8x1xf32>
    %139 = vector.broadcast %138 : vector<8x1xf32> to vector<8x256xf32>
    %140 = arith.mulf %137, %139 : vector<8x256xf32>
    %141 = arith.addf %131, %140 : vector<8x256xf32>
    %142 = vector.extract_strided_slice %116 {offsets = [0, 241], sizes = [8, 15], strides = [1, 1]} : vector<8x256xf32> to vector<8x15xf32>
    %143 = vector.extract_strided_slice %116 {offsets = [0, 0], sizes = [8, 241], strides = [1, 1]} : vector<8x256xf32> to vector<8x241xf32>
    %144 = tpu.concatenate %142, %143 in 1 : vector<8x15xf32>, vector<8x241xf32> -> vector<8x256xf32>
    %145 = vector.extract_strided_slice %3 {offsets = [2, 0], sizes = [1, 256], strides = [1, 1]} : vector<8x256xf32> to vector<1x256xf32>
    %146 = vector.broadcast %145 : vector<1x256xf32> to vector<8x256xf32>
    %147 = arith.mulf %144, %146 : vector<8x256xf32>
    %148 = vector.extract_strided_slice %0 {offsets = [0, 2], sizes = [8, 1], strides = [1, 1]} : vector<8x9xf32> to vector<8x1xf32>
    %149 = vector.broadcast %148 : vector<8x1xf32> to vector<8x256xf32>
    %150 = arith.mulf %147, %149 : vector<8x256xf32>
    %151 = arith.addf %141, %150 : vector<8x256xf32>
    %152 = vector.extract_strided_slice %116 {offsets = [0, 255], sizes = [8, 1], strides = [1, 1]} : vector<8x256xf32> to vector<8x1xf32>
    %153 = vector.extract_strided_slice %116 {offsets = [0, 0], sizes = [8, 255], strides = [1, 1]} : vector<8x256xf32> to vector<8x255xf32>
    %154 = tpu.concatenate %152, %153 in 1 : vector<8x1xf32>, vector<8x255xf32> -> vector<8x256xf32>
    %155 = vector.extract_strided_slice %3 {offsets = [3, 0], sizes = [1, 256], strides = [1, 1]} : vector<8x256xf32> to vector<1x256xf32>
    %156 = vector.broadcast %155 : vector<1x256xf32> to vector<8x256xf32>
    %157 = arith.mulf %154, %156 : vector<8x256xf32>
    %158 = vector.extract_strided_slice %0 {offsets = [0, 3], sizes = [8, 1], strides = [1, 1]} : vector<8x9xf32> to vector<8x1xf32>
    %159 = vector.broadcast %158 : vector<8x1xf32> to vector<8x256xf32>
    %160 = arith.mulf %157, %159 : vector<8x256xf32>
    %161 = arith.addf %151, %160 : vector<8x256xf32>
    %162 = vector.extract_strided_slice %116 {offsets = [0, 1], sizes = [8, 255], strides = [1, 1]} : vector<8x256xf32> to vector<8x255xf32>
    %163 = vector.extract_strided_slice %116 {offsets = [0, 0], sizes = [8, 1], strides = [1, 1]} : vector<8x256xf32> to vector<8x1xf32>
    %164 = tpu.concatenate %162, %163 in 1 : vector<8x255xf32>, vector<8x1xf32> -> vector<8x256xf32>
    %165 = vector.extract_strided_slice %3 {offsets = [4, 0], sizes = [1, 256], strides = [1, 1]} : vector<8x256xf32> to vector<1x256xf32>
    %166 = vector.broadcast %165 : vector<1x256xf32> to vector<8x256xf32>
    %167 = arith.mulf %164, %166 : vector<8x256xf32>
    %168 = vector.extract_strided_slice %0 {offsets = [0, 5], sizes = [8, 1], strides = [1, 1]} : vector<8x9xf32> to vector<8x1xf32>
    %169 = vector.broadcast %168 : vector<8x1xf32> to vector<8x256xf32>
    %170 = arith.mulf %167, %169 : vector<8x256xf32>
    %171 = arith.addf %161, %170 : vector<8x256xf32>
    %172 = vector.extract_strided_slice %116 {offsets = [0, 15], sizes = [8, 241], strides = [1, 1]} : vector<8x256xf32> to vector<8x241xf32>
    %173 = vector.extract_strided_slice %116 {offsets = [0, 0], sizes = [8, 15], strides = [1, 1]} : vector<8x256xf32> to vector<8x15xf32>
    %174 = tpu.concatenate %172, %173 in 1 : vector<8x241xf32>, vector<8x15xf32> -> vector<8x256xf32>
    %175 = vector.extract_strided_slice %3 {offsets = [5, 0], sizes = [1, 256], strides = [1, 1]} : vector<8x256xf32> to vector<1x256xf32>
    %176 = vector.broadcast %175 : vector<1x256xf32> to vector<8x256xf32>
    %177 = arith.mulf %174, %176 : vector<8x256xf32>
    %178 = vector.extract_strided_slice %0 {offsets = [0, 6], sizes = [8, 1], strides = [1, 1]} : vector<8x9xf32> to vector<8x1xf32>
    %179 = vector.broadcast %178 : vector<8x1xf32> to vector<8x256xf32>
    %180 = arith.mulf %177, %179 : vector<8x256xf32>
    %181 = arith.addf %171, %180 : vector<8x256xf32>
    %182 = vector.extract_strided_slice %116 {offsets = [0, 16], sizes = [8, 240], strides = [1, 1]} : vector<8x256xf32> to vector<8x240xf32>
    %183 = vector.extract_strided_slice %116 {offsets = [0, 0], sizes = [8, 16], strides = [1, 1]} : vector<8x256xf32> to vector<8x16xf32>
    %184 = tpu.concatenate %182, %183 in 1 : vector<8x240xf32>, vector<8x16xf32> -> vector<8x256xf32>
    %185 = vector.extract_strided_slice %3 {offsets = [6, 0], sizes = [1, 256], strides = [1, 1]} : vector<8x256xf32> to vector<1x256xf32>
    %186 = vector.broadcast %185 : vector<1x256xf32> to vector<8x256xf32>
    %187 = arith.mulf %184, %186 : vector<8x256xf32>
    %188 = vector.extract_strided_slice %0 {offsets = [0, 7], sizes = [8, 1], strides = [1, 1]} : vector<8x9xf32> to vector<8x1xf32>
    %189 = vector.broadcast %188 : vector<8x1xf32> to vector<8x256xf32>
    %190 = arith.mulf %187, %189 : vector<8x256xf32>
    %191 = arith.addf %181, %190 : vector<8x256xf32>
    %192 = vector.extract_strided_slice %116 {offsets = [0, 17], sizes = [8, 239], strides = [1, 1]} : vector<8x256xf32> to vector<8x239xf32>
    %193 = vector.extract_strided_slice %116 {offsets = [0, 0], sizes = [8, 17], strides = [1, 1]} : vector<8x256xf32> to vector<8x17xf32>
    %194 = tpu.concatenate %192, %193 in 1 : vector<8x239xf32>, vector<8x17xf32> -> vector<8x256xf32>
    %195 = vector.extract_strided_slice %3 {offsets = [7, 0], sizes = [1, 256], strides = [1, 1]} : vector<8x256xf32> to vector<1x256xf32>
    %196 = vector.broadcast %195 : vector<1x256xf32> to vector<8x256xf32>
    %197 = arith.mulf %194, %196 : vector<8x256xf32>
    %198 = vector.extract_strided_slice %0 {offsets = [0, 8], sizes = [8, 1], strides = [1, 1]} : vector<8x9xf32> to vector<8x1xf32>
    %199 = vector.broadcast %198 : vector<8x1xf32> to vector<8x256xf32>
    %200 = arith.mulf %197, %199 : vector<8x256xf32>
    %201 = arith.addf %191, %200 : vector<8x256xf32>
    %cst_24 = arith.constant dense<0.000000e+00> : vector<8xf32>
    %202 = vector.multi_reduction <add>, %201, %cst_24 [1] : vector<8x256xf32> to vector<8xf32>
    %203 = vector.shape_cast %202 : vector<8xf32> to vector<8x1xf32>
    %204 = arith.mulf %201, %201 : vector<8x256xf32>
    %cst_25 = arith.constant dense<0.000000e+00> : vector<8xf32>
    %205 = vector.multi_reduction <add>, %204, %cst_25 [1] : vector<8x256xf32> to vector<8xf32>
    %206 = vector.shape_cast %205 : vector<8xf32> to vector<8x1xf32>
    %cst_26 = arith.constant dense<0.000000e+00> : vector<8x1xf32>
    %207 = tpu.matmul %2, %203, %cst_26 {dimension_numbers = #tpu.dot_dimension_numbers<[1], [0], [0], [1], [0, 0, 1, 1], [], []>} : vector<8x8xf32>, vector<8x1xf32>, vector<8x1xf32> -> vector<8x1xf32>
    %cst_27 = arith.constant dense<0.000000e+00> : vector<8x1xf32>
    %208 = tpu.matmul %2, %206, %cst_27 {dimension_numbers = #tpu.dot_dimension_numbers<[1], [0], [0], [1], [0, 0, 1, 1], [], []>} : vector<8x8xf32>, vector<8x1xf32>, vector<8x1xf32> -> vector<8x1xf32>
    %209 = arith.mulf %207, %207 : vector<8x1xf32>
    %210 = arith.subf %208, %209 : vector<8x1xf32>
    %cst_28 = arith.constant 9.99999974E-6 : f32
    %211 = vector.broadcast %cst_28 : f32 to vector<8x1xf32>
    %212 = arith.addf %210, %211 : vector<8x1xf32>
    %213 = math.rsqrt %212 : vector<8x1xf32>
    %214 = vector.broadcast %207 : vector<8x1xf32> to vector<8x256xf32>
    %215 = arith.subf %201, %214 : vector<8x256xf32>
    %216 = vector.broadcast %213 : vector<8x1xf32> to vector<8x256xf32>
    %217 = arith.mulf %215, %216 : vector<8x256xf32>
    %cst_29 = arith.constant dense<0.000000e+00> : vector<16x256xf32>
    %218 = tpu.matmul %4, %217, %cst_29 {dimension_numbers = #tpu.dot_dimension_numbers<[1], [0], [0], [1], [0, 0, 1, 1], [], []>} : vector<16x8xf32>, vector<8x256xf32>, vector<16x256xf32> -> vector<16x256xf32>
    %219 = vector.broadcast %5 : vector<16x1xf32> to vector<16x256xf32>
    %220 = arith.addf %218, %219 : vector<16x256xf32>
    %c1_30 = arith.constant 1 : index
    %c0_31 = arith.constant 0 : index
    %c0_32 = arith.constant 0 : index
    %221 = vector.load %arg8[%c1_30, %c0_31, %c0_32] : memref<2x16x256xf32, #tpu.memory_space<vmem>>, vector<1x16x256xf32>
    %222 = vector.shape_cast %221 : vector<1x16x256xf32> to vector<16x256xf32>
    %223 = vector.shape_cast %220 : vector<16x256xf32> to vector<1x16x256xf32>
    tpu.vector_store %arg8[%c1_30, %c0_31, %c0_32], %223 {strides = array<i32>} : memref<2x16x256xf32, #tpu.memory_space<vmem>>, vector<1x16x256xf32>,
    return
  }
  func.func @transform_0(%arg0: i32) -> (i32, i32, i32) {
    %c0_i32 = arith.constant 0 : i32
    %c0_i32_0 = arith.constant 0 : i32
    %c0_i32_1 = arith.constant 0 : i32
    return %arg0, %c0_i32, %c0_i32_0 : i32, i32, i32
  }
  func.func @transform_1(%arg0: i32) -> (i32, i32) {
    %c0_i32 = arith.constant 0 : i32
    %c0_i32_0 = arith.constant 0 : i32
    %c0_i32_1 = arith.constant 0 : i32
    return %c0_i32, %c0_i32_0 : i32, i32
  }
  func.func @transform_2(%arg0: i32) -> (i32, i32) {
    %c0_i32 = arith.constant 0 : i32
    %c0_i32_0 = arith.constant 0 : i32
    %c0_i32_1 = arith.constant 0 : i32
    return %c0_i32, %c0_i32_0 : i32, i32
  }
  func.func @transform_3(%arg0: i32) -> (i32, i32) {
    %c0_i32 = arith.constant 0 : i32
    %c0_i32_0 = arith.constant 0 : i32
    %c0_i32_1 = arith.constant 0 : i32
    return %c0_i32, %c0_i32_0 : i32, i32
  }
  func.func @transform_4(%arg0: i32) -> (i32, i32) {
    %c0_i32 = arith.constant 0 : i32
    %c0_i32_0 = arith.constant 0 : i32
    %c0_i32_1 = arith.constant 0 : i32
    return %c0_i32, %c0_i32_0 : i32, i32
  }
  func.func @transform_5(%arg0: i32) -> (i32, i32) {
    %c0_i32 = arith.constant 0 : i32
    %c0_i32_0 = arith.constant 0 : i32
    %c0_i32_1 = arith.constant 0 : i32
    return %c0_i32, %c0_i32_0 : i32, i32
  }
  func.func @transform_6(%arg0: i32) -> (i32, i32) {
    %c0_i32 = arith.constant 0 : i32
    %c0_i32_0 = arith.constant 0 : i32
    %c0_i32_1 = arith.constant 0 : i32
    return %c0_i32, %c0_i32_0 : i32, i32
  }
  func.func @transform_7(%arg0: i32) -> (i32, i32, i32) {
    %c0_i32 = arith.constant 0 : i32
    %c0_i32_0 = arith.constant 0 : i32
    %c0_i32_1 = arith.constant 0 : i32
    return %arg0, %c0_i32, %c0_i32_0 : i32, i32, i32
  }
}

</mosaic_0001>

<bundles_post_ra>
// kernel: tpu_custom_call.1
= control target key start
LH: loop header
LB: loop body
LE: loop exit
PB: predicated region body
PF: predicated region fallthrough
CT: control target
= control target key end

     0   :  { %6 = vsyncpa [#allocation3], 0  ;;  %s118_s0 = inlined_call_operand.hbm [shape: f32[8,128], index: 0, kind: input, shape index: {}]   ;;  %s119_s1 = inlined_call_operand.hbm [shape: f32[8,128], index: 1, kind: output, shape index: {}]  }
   0x1   :  { %7 = vsyncpa [#allocation4], 0  ;;  %s13_s8 = sshll.u32 %s118_s0, 4  ;;  %s99_s9 = smov [#allocation2]   ;;  %s14_s8 = int_to_ptr.hbm [resolvable:$true] %s13_s8 }
   0x2   :  { %s15_s10 = sshll.u32 %s99_s9, 4  ;;  %s16_s10 = int_to_ptr.vmem [resolvable:$true] %s15_s10 }
   0x3   :  { %18 = dma.hbm_to_vmem [thread:$0]  %s14_s8, 128, %s16_s10, [#allocation3]  }
   0x4   :  { %95 = dma.done.wait [#allocation3], 128  }
   0x5   :  { %96 = vsyncadd [#allocation3], 4294967168  ;;  %v23_v0 = vld [vmem:[#allocation2] sm:$0xff]  ;;  %s100_s11 = smov 1   ;;  %s101_s12 = smov [#allocation5]  }
   0x6   :  { %24 = vrot.lane.b32.xlu0 %v23_v0, %s100_s11  ;;  %s32_s13 = sshll.u32 %s101_s12, 4  ;;  %s34_s16 = sshll.u32 %s119_s1, 4  ;;  %s33_s13 = int_to_ptr.vmem [resolvable:$true] %s32_s13  ;;  %s35_s16 = int_to_ptr.hbm [resolvable:$true] %s34_s16 }
  0x78   :  { %v25_v1 = vpop.permute.xlu0 %24 }
  0x79   :  { %26 = vst [vmem:[#allocation5] sm:$0xff] %v25_v1 }
  0x7a   :  { %37 = dma.vmem_to_hbm [thread:$0]  %s33_s13, 128, %s35_s16, [#allocation4]  }
  0x7b   :  { %97 = dma.done.wait [#allocation4], 128  }
  0x7c   :  { %98 = vsyncadd [#allocation4], 4294967168 }
  0x7d   :  { %42 = vsyncpa [#allocation3], 1 }
  0x7e   :  { %43 = vsyncpa [#allocation4], 1 }

// kernel: depthwise_conv2d_module.1
= control target key start
LH: loop header
LB: loop body
LE: loop exit
PB: predicated region body
PF: predicated region fallthrough
CT: control target
= control target key end

     0   :  { %s1086_s24 = smov 0   ;;  %s1416_s0 = inlined_call_operand.vmem [shape: f32[4,8,256], index: 0, kind: input, shape index: {}]   ;;  %s1417_s1 = inlined_call_operand.vmem [shape: f32[8,9], index: 1, kind: input, shape index: {}]   ;;  %s1418_s2 = inlined_call_operand.vmem [shape: f32[8,1], index: 2, kind: input, shape index: {}]   ;;  %s1419_s3 = inlined_call_operand.vmem [shape: f32[8,8], index: 3, kind: input, shape index: {}]   ;;  %s1420_s4 = inlined_call_operand.vmem [shape: f32[8,256], index: 4, kind: input, shape index: {}]   ;;  %s1421_s5 = inlined_call_operand.vmem [shape: f32[16,8], index: 5, kind: input, shape index: {}]   ;;  %s1422_s6 = inlined_call_operand.vmem [shape: f32[16,1], index: 6, kind: input, shape index: {}]   ;;  %s1423_s7 = inlined_call_operand.vmem [shape: f32[4,16,256], index: 7, kind: output, shape index: {}]  }
   0x1 LB: > { %s948_s25 = sadd.s32 4294967295, %s1027_s24   ;;  %p952_p0 = scmp.ge.s32.totalorder %s1027_s24, 1  ;;  %s1027_s24 = sphi %s1086_s24, %s17_s24  }
   0x2   : > { %p239_p1 = scmp.lt.s32.totalorder %s1027_s24, 3 }
   0x4   : > { %p240_p2 = pnand %p952_p0, %p239_p1 }
   0x5   : > { %s953_s28 = sshll.u32 (!%p240_p2), %s948_s25, 1  ;;  %s1031_s12 = smov (!%p240_p2), 17  }
   0x6   : > { %243 = sbr.rel (%p240_p2) target bundleno = 755 (0x2f3), region = 48  ;;  %p274_p3 = scmp.lt.s32.totalorder (!%p240_p2), %s953_s28, 3 }
   0x7   : > { %s1032_s13 = smov (!%p240_p2), 16   ;;  %s1034_s14 = smov (!%p240_p2), 15  }
   0x8   : > { %s1035_s15 = smov (!%p240_p2), 1   ;;  %s1037_s16 = smov (!%p240_p2), 127  }
   0x9   : > { %s1039_s17 = smov (!%p240_p2), 113   ;;  %s1041_s18 = smov (!%p240_p2), 112  }
   0xa   : > { %s1044_s19 = smov (!%p240_p2), 111  }
   0xb   : > { %v1097_v0 = vld [vmem:[%s1417_s1] sm:$0xff]  ;;  %v1029_v2 = vmov 4   ;;  %v1030_v3 = vmov 0   ;;  %s1425_s28 = smov (!%p274_p3, %s953_s28), 3  ;;  %v1033_v6 = vmov 1   ;;  %v1036_v7 = vmov 7  }
   0xc   : > { %v288_v1 = vld [vmem:[%s1418_s2] sm:$0xff]  ;;  %1006 = vset.pattern.permute.xlu1 %v1029_v2  ;;  %1007 = vset.pattern.permute.xlu2 %v1030_v3  ;;  %s979_s8 = sshll.u32 %s1425_s28, 4  ;;  %v1038_v8 = vmov 2   ;;  %v1040_v9 = vmov 3   ;;  %v1042_v10 = vmov 5   ;;  %v1043_v13 = vmov 6  }
   0xd   : > { %300 = vperm.xlu1 %1006, %v1097_v0   ;;  %307 = vperm.xlu2 %1007, %v288_v1   ;;  %s1110_s11 = scalar_lea.vmem %s1416_s0, %s979_s8  ;;  %v1045_v14 = vmov 8   ;;  %v1197_v41 = vld [vmem:[%s1420_s4] sm:$0xff]  ;;  %v1202_v42 = vld [vmem:[%s1420_s4 + $0x8] sm:$0xff]  ;;  %vm341_vm0 = vcmask 130048   ;;  %vm319_vm1 = vcmask 138240   ;;  %vm363_vm2 = vcmask 121856  }
   0xe   : > { %v1113_v4 = vld [vmem:[%s1110_s11 + $0x8] sm:$0xff]  ;;  %v1118_v5 = vld [vmem:[%s1110_s11] sm:$0xff]  ;;  %1013 = vset.pattern.permute.xlu0 %v1036_v7  ;;  %v965_v11 = vld [vmem:[%s1110_s11 + $0x10] sm:$0xff]  ;;  %v346_v43 = vperm.slane %v1197_v41, 1  ;;  %v347_v45 = vperm.slane %v1202_v42, 1  ;;  %v324_v46 = vperm.slane %v1197_v41, 0 }
   0xf   : > { %313 = vrot.lane.b32.xlu0 %v1113_v4, %s1031_s12  ;;  %v966_v12 = vld [vmem:[%s1110_s11 + $0x18] sm:$0xff]  ;;  %v325_v47 = vperm.slane %v1202_v42, 0  ;;  %v368_v50 = vperm.slane %v1197_v41, 2  ;;  %v369_v52 = vperm.slane %v1202_v42, 2  ;;  %vm385_vm3 = vcmask 7168  }
  0x10   : > { %v390_v53 = vperm.slane %v1197_v41, 3  ;;  %v391_v54 = vperm.slane %v1202_v42, 3  ;;  %vm406_vm4 = vcmask 1039360   ;;  %v412_v56 = vperm.slane %v1197_v41, 4 }
  0x11   : > { %v413_v57 = vperm.slane %v1202_v42, 4  ;;  %vm428_vm5 = vcmask 924672   ;;  %v434_v60 = vperm.slane %v1197_v41, 5  ;;  %v435_v61 = vperm.slane %v1202_v42, 5 }
  0x12   : > { %vm450_vm6 = vcmask 916480   ;;  %vm472_vm7 = vcmask 908288   ;;  %vm498_vm8 = vcmask 64512  }
  0x15   : > { %336 = vrot.lane.b32.xlu1 %v1113_v4, %s1032_s13  ;;  %339 = vrot.lane.b32.xlu2 %v1118_v5, %s1032_s13 }
  0x16   : > { %1008 = vset.pattern.permute.xlu1 %v1033_v6 }
  0x17   : > { %317 = vrot.lane.b32.xlu0 %v1118_v5, %s1031_s12 }
  0x1d   : > { %358 = vrot.lane.b32.xlu1 %v1113_v4, %s1034_s14  ;;  %361 = vrot.lane.b32.xlu2 %v1118_v5, %s1034_s14 }
  0x1f   : > { %383 = vrot.lane.b32.xlu0 %v1118_v5, %s1035_s15 }
  0x25   : > { %351 = vperm.xlu1 %1008, %v1097_v0   ;;  %380 = vrot.lane.b32.xlu2 %v1113_v4, %s1035_s15 }
  0x27   : > { %404 = vrot.lane.b32.xlu0 %v1113_v4, %s1037_s16 }
  0x2d   : > { %1009 = vset.pattern.permute.xlu1 %v1038_v8  ;;  %402 = vrot.lane.b32.xlu2 %v1118_v5, %s1037_s16  ;;  %v456_v8 = vperm.slane %v1197_v41, 6 }
  0x2e   : > { %373 = vperm.xlu1 %1009, %v1097_v0  }
  0x2f   : > { %426 = vrot.lane.b32.xlu0 %v1113_v4, %s1039_s17 }
  0x35   : > { %424 = vrot.lane.b32.xlu2 %v1118_v5, %s1039_s17 }
  0x36   : > { %1010 = vset.pattern.permute.xlu1 %v1040_v9 }
  0x37   : > { %395 = vperm.xlu1 %1010, %v1097_v0   ;;  %448 = vrot.lane.b32.xlu0 %v1113_v4, %s1041_s18 }
  0x3d   : > { %446 = vrot.lane.b32.xlu2 %v1118_v5, %s1041_s18 }
  0x3f   : > { %1011 = vset.pattern.permute.xlu1 %v1042_v10  ;;  %647 = vrot.lane.b32.xlu0 %v965_v11, %s1031_s12 }
  0x40   : > { %417 = vperm.xlu1 %1011, %v1097_v0  }
  0x45   : > { %643 = vrot.lane.b32.xlu2 %v966_v12, %s1031_s12 }
  0x47   : > { %461 = vperm.xlu0 %1013, %v1097_v0  }
  0x48   : > { %1012 = vset.pattern.permute.xlu1 %v1043_v13 }
  0x49   : > { %439 = vperm.xlu1 %1012, %v1097_v0  }
  0x4d   : > { %470 = vrot.lane.b32.xlu2 %v1113_v4, %s1044_s19 }
  0x4f   : > { %1014 = vset.pattern.permute.xlu0 %v1030_v3 }
  0x50   : > { %329 = vperm.xlu0 %1014, %v1097_v0  }
  0x51   : > { %468 = vrot.lane.b32.xlu1 %v1118_v5, %s1044_s19 }
  0x52   : > { %1015 = vset.pattern.permute.xlu1 %v1045_v14 }
  0x55   : > { %662 = vrot.lane.b32.xlu2 %v965_v11, %s1032_s13 }
  0x58   : > { %677 = vrot.lane.b32.xlu0 %v965_v11, %s1034_s14 }
  0x59   : > { %659 = vrot.lane.b32.xlu1 %v966_v12, %s1032_s13  ;;  %s980_s13 = sshll.u32 %s1425_s28, 5 }
  0x5d   : > { %674 = vrot.lane.b32.xlu2 %v966_v12, %s1034_s14 }
  0x60   : > { %704 = vrot.lane.b32.xlu0 %v965_v11, %s1037_s16 }
  0x61   : > { %483 = vperm.xlu1 %1015, %v1097_v0  }
  0x65   : > { %692 = vrot.lane.b32.xlu2 %v965_v11, %s1035_s15 }
  0x67   : > { %v308_v15 = vpop.permute.xlu2 %307 }
  0x68   : > { %721 = vrot.lane.b32.xlu0 %v966_v12, %s1039_s17 }
  0x69   : > { %689 = vrot.lane.b32.xlu1 %v966_v12, %s1035_s15 }
  0x6a   : > { %1016 = vset.pattern.permute.xlu1 %v1030_v3 }
  0x6d   : > { %719 = vrot.lane.b32.xlu2 %v965_v11, %s1039_s17 }
  0x6f   : > { %v340_v16 = vpop.permute.xlu2 %339 }
  0x70   : > { %749 = vrot.lane.b32.xlu0 %v965_v11, %s1044_s19 }
  0x71   : > { %706 = vrot.lane.b32.xlu1 %v966_v12, %s1037_s16  ;;  %s285_s16 = scalar_lea.vmem %s1423_s7, %s980_s13 }
  0x75   : > { %736 = vrot.lane.b32.xlu2 %v966_v12, %s1041_s18 }
  0x77   : > { %v362_v17 = vpop.permute.xlu2 %361 }
  0x79   : > { %734 = vrot.lane.b32.xlu1 %v965_v11, %s1041_s18 }
  0x7f   : > { %v301_v18 = vpop.permute.xlu1 %300  ;;  %v381_v25 = vpop.permute.xlu2 %380 }
  0x80   : > { %v638_v19 = vmul.f32 %v965_v11, %v301_v18  ;;  %v639_v20 = vmul.f32 %v966_v12, %v301_v18  ;;  %v303_v48 = vmul.f32 %v301_v18, %v1118_v5  ;;  %v304_v49 = vmul.f32 %v301_v18, %v1113_v4 }
  0x81   : > { %751 = vrot.lane.b32.xlu1 %v966_v12, %s1044_s19  ;;  %v314_v23 = vpop.permute.xlu0 %313  ;;  %v457_v12 = vperm.slane %v1202_v42, 6 }
  0x82   : > { %v1174_v21 = vadd.f32 %v638_v19, %v308_v15  ;;  %v1176_v22 = vadd.f32 %v639_v20, %v308_v15  ;;  %v310_v62 = vadd.f32 %v308_v15, %v303_v48  ;;  %v311_v63 = vadd.f32 %v308_v15, %v304_v49 }
  0x83   : > { %v479_v48 = vperm.slane %v1202_v42, 7 }
  0x87   : > { %v337_v24 = vpop.permute.xlu1 %336  ;;  %v403_v28 = vpop.permute.xlu2 %402 }
  0x88   : > { %v345_v55 = vsel %vm341_vm0, %v337_v24, %v340_v16  ;;  %v342_v59 = vsel %vm341_vm0, %v340_v16, %v337_v24 }
  0x89   : > { %v318_v26 = vpop.permute.xlu0 %317  ;;  %v348_v2 = vmul.f32 %v346_v43, %v345_v55  ;;  %v349_v6 = vmul.f32 %v347_v45, %v342_v59 }
  0x8a   : > { %v320_v0 = vsel %vm319_vm1, %v318_v26, %v314_v23  ;;  %v323_v1 = vsel %vm319_vm1, %v314_v23, %v318_v26 }
  0x8b   : > { %v326_v9 = vmul.f32 %v324_v46, %v323_v1  ;;  %v327_v10 = vmul.f32 %v325_v47, %v320_v0 }
  0x8f   : > { %v359_v27 = vpop.permute.xlu1 %358  ;;  %v1180_v31 = vpop.permute.xlu2 %424 }
  0x90   : > { %v364_v3 = vsel %vm363_vm2, %v362_v17, %v359_v27  ;;  %v367_v4 = vsel %vm363_vm2, %v359_v27, %v362_v17  ;;  %v478_v27 = vperm.slane %v1197_v41, 7 }
  0x91   : > { %v384_v29 = vpop.permute.xlu0 %383  ;;  %v370_v13 = vmul.f32 %v368_v50, %v367_v4  ;;  %v371_v14 = vmul.f32 %v369_v52, %v364_v3 }
  0x92   : > { %v389_v5 = vsel %vm385_vm3, %v381_v25, %v384_v29  ;;  %v386_v7 = vsel %vm385_vm3, %v384_v29, %v381_v25 }
  0x93   : > { %v392_v15 = vmul.f32 %v390_v53, %v389_v5  ;;  %v393_v19 = vmul.f32 %v391_v54, %v386_v7 }
  0x97   : > { %v1178_v30 = vpop.permute.xlu1 %351  ;;  %v1186_v35 = vpop.permute.xlu2 %446 }
  0x98   : > { %v354_v20 = vmul.f32 %v1178_v30, %v348_v2  ;;  %v355_v23 = vmul.f32 %v1178_v30, %v349_v6 }
  0x99   : > { %v405_v32 = vpop.permute.xlu0 %404 }
  0x9a   : > { %v407_v11 = vsel %vm406_vm4, %v403_v28, %v405_v32  ;;  %v411_v16 = vsel %vm406_vm4, %v405_v32, %v403_v28 }
  0x9b   : > { %v414_v24 = vmul.f32 %v412_v56, %v407_v11  ;;  %v415_v28 = vmul.f32 %v413_v57, %v411_v16 }
  0x9f   : > { %v644_v38 = vpop.permute.xlu2 %643 }
  0xa0   : > { %v1182_v33 = vpop.permute.xlu1 %373 }
  0xa1   : > { %v1184_v34 = vpop.permute.xlu0 %426  ;;  %v376_v55 = vmul.f32 %v1182_v33, %v370_v13 }
  0xa2   : > { %v429_v29 = vsel %vm428_vm5, %v1180_v31, %v1184_v34  ;;  %v433_v32 = vsel %vm428_vm5, %v1184_v34, %v1180_v31 }
  0xa3   : > { %v436_v31 = vmul.f32 %v434_v60, %v429_v29  ;;  %v437_v34 = vmul.f32 %v435_v61, %v433_v32 }
  0xa7   : > { %v1205_v44 = vpop.permute.xlu2 %470 }
  0xa9   : > { %v1188_v36 = vpop.permute.xlu1 %395  ;;  %v1190_v37 = vpop.permute.xlu0 %448 }
  0xaa   : > { %v451_v0 = vsel %vm450_vm6, %v1186_v35, %v1190_v37  ;;  %v455_v1 = vsel %vm450_vm6, %v1190_v37, %v1186_v35  ;;  %v398_v6 = vmul.f32 %v1188_v36, %v392_v15  ;;  %v399_v7 = vmul.f32 %v1188_v36, %v393_v19 }
  0xab   : > { %v458_v11 = vmul.f32 %v456_v8, %v451_v0  ;;  %v459_v35 = vmul.f32 %v457_v12, %v455_v1 }
  0xaf   : > { %v663_v18 = vpop.permute.xlu2 %662 }
  0xb1   : > { %v648_v40 = vpop.permute.xlu0 %647 }
  0xb2   : > { %v1192_v39 = vpop.permute.xlu1 %417  ;;  %v649_v25 = vsel %vm319_vm1, %v648_v40, %v644_v38  ;;  %v652_v26 = vsel %vm319_vm1, %v644_v38, %v648_v40  ;;  %v377_v38 = vmul.f32 %v1182_v33, %v371_v14 }
  0xb3   : > { %v653_v2 = vmul.f32 %v652_v26, %v324_v46  ;;  %v654_v3 = vmul.f32 %v649_v25, %v325_v47  ;;  %v420_v13 = vmul.f32 %v1192_v39, %v414_v24 }
  0xb7   : > { %v675_v26 = vpop.permute.xlu2 %674 }
  0xb9   : > { %v1221_v58 = vpop.permute.xlu0 %461 }
  0xbb   : > { %v1213_v51 = vpop.permute.xlu1 %439 }
  0xc2   : > { %v330_v49 = vpop.permute.xlu0 %329 }
  0xc3   : > { %v469_v17 = vpop.permute.xlu1 %468  ;;  %v332_v40 = vmul.f32 %v330_v49, %v326_v9  ;;  %v333_v59 = vmul.f32 %v330_v49, %v327_v10  ;;  %v655_v9 = vmul.f32 %v653_v2, %v330_v49  ;;  %v656_v10 = vmul.f32 %v654_v3, %v330_v49 }
  0xc4   : > { %v464_v2 = vmul.f32 %v1221_v58, %v458_v11  ;;  %v465_v3 = vmul.f32 %v1221_v58, %v459_v35 }
  0xc5   : > { %v334_v4 = vadd.f32 %v332_v40, %v310_v62  ;;  %v335_v5 = vadd.f32 %v333_v59, %v311_v63  ;;  %v421_v62 = vmul.f32 %v1192_v39, %v415_v28  ;;  %v657_v24 = vadd.f32 %v655_v9, %v1174_v21 }
  0xc6   : > { %v658_v28 = vadd.f32 %v656_v10, %v1176_v22 }
  0xc7   : > { %v356_v37 = vadd.f32 %v354_v20, %v334_v4  ;;  %v357_v46 = vadd.f32 %v355_v23, %v335_v5  ;;  %v473_v20 = vsel %vm472_vm7, %v469_v17, %v1205_v44  ;;  %v477_v23 = vsel %vm472_vm7, %v1205_v44, %v469_v17 }
  0xc8   : > { %v480_v59 = vmul.f32 %v478_v27, %v473_v20 }
  0xc9   : > { %v378_v15 = vadd.f32 %v376_v55, %v356_v37  ;;  %v379_v16 = vadd.f32 %v377_v38, %v357_v46  ;;  %v443_v55 = vmul.f32 %v1213_v51, %v437_v34  ;;  %v693_v46 = vpop.permute.xlu2 %692 }
  0xcb   : > { %v660_v47 = vpop.permute.xlu1 %659  ;;  %v400_v29 = vadd.f32 %v398_v6, %v378_v15  ;;  %v401_v32 = vadd.f32 %v399_v7, %v379_v16 }
  0xcc   : > { %v664_v63 = vsel %vm341_vm0, %v663_v18, %v660_v47  ;;  %v667_v14 = vsel %vm341_vm0, %v660_v47, %v663_v18  ;;  %v678_v18 = vpop.permute.xlu0 %677 }
  0xcd   : > { %v668_v19 = vmul.f32 %v667_v14, %v346_v43  ;;  %v669_v25 = vmul.f32 %v664_v63, %v347_v45  ;;  %v442_v45 = vmul.f32 %v1213_v51, %v436_v31  ;;  %v679_v38 = vsel %vm363_vm2, %v678_v18, %v675_v26 }
  0xce   : > { %v682_v40 = vsel %vm363_vm2, %v675_v26, %v678_v18  ;;  %v684_v22 = vmul.f32 %v679_v38, %v369_v52  ;;  %v422_v0 = vadd.f32 %v420_v13, %v400_v29  ;;  %v423_v1 = vadd.f32 %v421_v62, %v401_v32 }
  0xcf   : > { %v670_v49 = vmul.f32 %v668_v19, %v1178_v30  ;;  %v671_v43 = vmul.f32 %v669_v25, %v1178_v30  ;;  %v683_v21 = vmul.f32 %v682_v40, %v368_v50  ;;  %v481_v30 = vmul.f32 %v479_v48, %v477_v23 }
  0xd0   : > { %v686_v34 = vmul.f32 %v684_v22, %v1182_v33  ;;  %v444_v5 = vadd.f32 %v442_v45, %v422_v0  ;;  %v445_v6 = vadd.f32 %v443_v55, %v423_v1 }
  0xd1   : > { %v672_v44 = vadd.f32 %v670_v49, %v657_v24  ;;  %v673_v17 = vadd.f32 %v671_v43, %v658_v28  ;;  %v685_v31 = vmul.f32 %v683_v21, %v1182_v33  ;;  %v720_v28 = vpop.permute.xlu2 %719 }
  0xd2   : > { %v466_v10 = vadd.f32 %v464_v2, %v444_v5  ;;  %v467_v37 = vadd.f32 %v465_v3, %v445_v6 }
  0xd3   : > { %v1314_v50 = vpop.permute.xlu1 %483  ;;  %v687_v7 = vadd.f32 %v685_v31, %v672_v44  ;;  %v688_v9 = vadd.f32 %v686_v34, %v673_v17 }
  0xd4   : > { %v486_v52 = vmul.f32 %v1314_v50, %v480_v59  ;;  %v487_v4 = vmul.f32 %v1314_v50, %v481_v30  ;;  %v705_v25 = vpop.permute.xlu0 %704 }
  0xd6   : > { %v1318_v11 = vadd.f32 %v486_v52, %v466_v10  ;;  %v1320_v35 = vadd.f32 %v487_v4, %v467_v37 }
  0xd8   : > { %v490_v33 = vadd.f32 %v1320_v35, %v1318_v11  ;;  %v493_v47 = vmul.f32 %v1318_v11, %v1318_v11  ;;  %v494_v13 = vmul.f32 %v1320_v35, %v1320_v35 }
  0xd9   : > { %v737_v43 = vpop.permute.xlu2 %736 }
  0xda   : > { %491 = vadd.xlane.f32.xlu2 %v490_v33  ;;  %v495_v15 = vadd.f32 %v494_v13, %v493_v47 }
  0xdb   : > { %v690_v62 = vpop.permute.xlu1 %689 }
  0xdc   : > { %v694_v63 = vsel %vm385_vm3, %v693_v46, %v690_v62  ;;  %v697_v14 = vsel %vm385_vm3, %v690_v62, %v693_v46  ;;  %496 = vadd.xlane.f32.xlu0 %v495_v15  ;;  %v722_v49 = vpop.permute.xlu0 %721 }
  0xdd   : > { %v698_v16 = vmul.f32 %v697_v14, %v390_v53  ;;  %v699_v19 = vmul.f32 %v694_v63, %v391_v54  ;;  %v723_v55 = vsel %vm428_vm5, %v720_v28, %v722_v49 }
  0xdf   : > { %v700_v26 = vmul.f32 %v698_v16, %v1188_v36  ;;  %v701_v20 = vmul.f32 %v699_v19, %v1188_v36  ;;  %v727_v36 = vsel %vm428_vm5, %v722_v49, %v720_v28 }
  0xe1   : > { %v702_v23 = vadd.f32 %v700_v26, %v687_v7  ;;  %v703_v24 = vadd.f32 %v701_v20, %v688_v9 }
  0xe3   : > { %v707_v18 = vpop.permute.xlu1 %706 }
  0xe4   : > { %v708_v29 = vsel %vm406_vm4, %v705_v25, %v707_v18  ;;  %v712_v32 = vsel %vm406_vm4, %v707_v18, %v705_v25  ;;  %v750_v0 = vpop.permute.xlu0 %749 }
  0xe5   : > { %v713_v53 = vmul.f32 %v708_v29, %v412_v56  ;;  %v714_v54 = vmul.f32 %v712_v32, %v413_v57  ;;  %v728_v56 = vmul.f32 %v723_v55, %v434_v60  ;;  %v729_v57 = vmul.f32 %v727_v36, %v435_v61  ;;  %v294_v32 = vld [vmem:[%s1422_s6] sm:$0xff] }
  0xe7   : > { %v715_v44 = vmul.f32 %v713_v53, %v1192_v39  ;;  %v716_v17 = vmul.f32 %v714_v54, %v1192_v39  ;;  %v730_v1 = vmul.f32 %v728_v56, %v1213_v51  ;;  %v731_v2 = vmul.f32 %v729_v57, %v1213_v51 }
  0xe9   : > { %v717_v59 = vadd.f32 %v715_v44, %v702_v23  ;;  %v718_v30 = vadd.f32 %v716_v17, %v703_v24 }
  0xeb   : > { %v735_v45 = vpop.permute.xlu1 %734  ;;  %v733_v34 = vadd.f32 %v731_v2, %v718_v30  ;;  %v293_v2 = vld [vmem:[%s1421_s5 + $0x8] sm:$0xff] }
  0xec   : > { %v738_v38 = vsel %vm450_vm6, %v735_v45, %v737_v43  ;;  %v742_v40 = vsel %vm450_vm6, %v737_v43, %v735_v45 }
  0xed   : > { %v743_v21 = vmul.f32 %v738_v38, %v456_v8  ;;  %v744_v22 = vmul.f32 %v742_v40, %v457_v12  ;;  %v732_v8 = vadd.f32 %v730_v1, %v717_v59  ;;  %v295_v38 = vld [vmem:[%s1422_s6 + $0x8] sm:$0xff] }
  0xef   : > { %v745_v39 = vmul.f32 %v743_v21, %v1221_v58  ;;  %v746_v60 = vmul.f32 %v744_v22, %v1221_v58  ;;  %v292_v22 = vld [vmem:[%s1421_s5] sm:$0xff] }
  0xf1   : > { %v747_v4 = vadd.f32 %v745_v39, %v732_v8  ;;  %v748_v5 = vadd.f32 %v746_v60, %v733_v34 }
  0xf3   : > { %v752_v3 = vpop.permute.xlu1 %751 }
  0xf4   : > { %v753_v61 = vsel %vm472_vm7, %v750_v0, %v752_v3  ;;  %v757_v31 = vsel %vm472_vm7, %v752_v3, %v750_v0 }
  0xf5   : > { %v758_v12 = vmul.f32 %v753_v61, %v478_v27  ;;  %v759_v52 = vmul.f32 %v757_v31, %v479_v48  ;;  %v289_v48 = vld [vmem:[%s1419_s3] sm:$0xff] }
  0xf7   : > { %v760_v51 = vmul.f32 %v758_v12, %v1314_v50  ;;  %v761_v6 = vmul.f32 %v759_v52, %v1314_v50 }
  0xf9   : > { %v1368_v58 = vadd.f32 %v760_v51, %v747_v4  ;;  %v1370_v7 = vadd.f32 %v761_v6, %v748_v5 }
  0xfb   : > { %v764_v9 = vadd.f32 %v1370_v7, %v1368_v58  ;;  %v767_v41 = vmul.f32 %v1368_v58, %v1368_v58  ;;  %v768_v42 = vmul.f32 %v1370_v7, %v1370_v7 }
  0xfd   : > { %765 = vadd.xlane.f32.xlu1 %v764_v9  ;;  %v769_v27 = vadd.f32 %v768_v42, %v767_v41 }
  0xff   : > { %770 = vadd.xlane.f32.xlu2 %v769_v27 }
 0x14d   : > { %v492_v50 = vpop.xlane.xlu2 %491 }
 0x14e   : > { %517 = vmatpush.msra.mxu2 %v492_v50 }
 0x14f   : > { %v497_v10 = vpop.xlane.xlu0 %496  ;;  %959 = vmatmul.msk.f32.vlgmr.msra.gmra.mxu2 %vm498_vm8, %v289_v48 }
 0x150   : > { %537 = vmatpush.msra.mxu3 %v497_v10 }
 0x151   : > { %960 = vmatmul.msk.f32.vlgmr.msra.gmra.mxu3 %vm498_vm8, %v289_v48 }
 0x170   : > { %v766_v37 = vpop.xlane.xlu1 %765 }
 0x171   : > { %787 = vmatpush.msra.mxu0 %v766_v37 }
 0x172   : > { %967 = vmatmul.msk.f32.vlgmr.msra.gmra.mxu0 %vm498_vm8, %v289_v48  ;;  %v771_v46 = vpop.xlane.xlu2 %770 }
 0x173   : > { %807 = vmatpush.msra.mxu1 %v771_v46 }
 0x174   : > { %968 = vmatmul.msk.f32.vlgmr.msra.gmra.mxu1 %vm498_vm8, %v289_v48 }
 0x1d2   : > { %v519_v33 = vpop.f32.mrf.mxu2 }
 0x1d3   : > { %v542_v47 = vmul.f32 %v519_v33, %v519_v33  ;;  %557 = vperm.xlu2 %1007, %v519_v33  }
 0x1d4   : > { %v539_v13 = vpop.f32.mrf.mxu3 }
 0x1d5   : > { %v543_v62 = vsub.f32 %v539_v13, %v542_v47 }
 0x1d7   : > { %v544_v63 = vadd.f32 1e-05, %v543_v62 }
 0x1d9   : > { %1017 = vrsqrt.f32 %v544_v63  ;;  %vm551_vm10 = vweird.f32 %v544_v63 }
 0x1df   : > { %v1018_v14 = vpop.eup %1017 }
 0x1e0   : > { %v546_v15 = vmul.f32 %v1018_v14, %v544_v63  ;;  %vm552_vm9 = vweird.f32 %v1018_v14 }
 0x1e1   : > { %vm553_vm11 = vmor %vm551_vm10, %vm552_vm9 }
 0x1e2   : > { %v547_v16 = vmul.f32 %v1018_v14, %v546_v15 }
 0x1e4   : > { %v548_v19 = vmul.f32 0.5, %v547_v16 }
 0x1e6   : > { %v549_v25 = vsub.f32 1.5, %v548_v19 }
 0x1e8   : > { %v550_v26 = vmul.f32 %v1018_v14, %v549_v25 }
 0x1ea   : > { %v554_v20 = vsel %vm553_vm11, %v1018_v14, %v550_v26 }
 0x1eb   : > { %564 = vperm.xlu0 %1014, %v554_v20  }
 0x1ef   : > { %v789_v23 = vpop.f32.mrf.mxu0 }
 0x1f0   : > { %v812_v24 = vmul.f32 %v789_v23, %v789_v23  ;;  %827 = vperm.xlu1 %1016, %v789_v23  }
 0x1f1   : > { %v809_v28 = vpop.f32.mrf.mxu1 }
 0x1f2   : > { %v813_v18 = vsub.f32 %v809_v28, %v812_v24 }
 0x1f4   : > { %v814_v29 = vadd.f32 1e-05, %v813_v18 }
 0x1f6   : > { %1019 = vrsqrt.f32 %v814_v29  ;;  %vm821_vm13 = vweird.f32 %v814_v29 }
 0x1f8   : > { %571 = vperm.xlu1 %1016, %v294_v32  }
 0x1fc   : > { %v1020_v49 = vpop.eup %1019 }
 0x1fd   : > { %v816_v53 = vmul.f32 %v1020_v49, %v814_v29  ;;  %vm822_vm12 = vweird.f32 %v1020_v49 }
 0x1fe   : > { %vm823_vm14 = vmor %vm821_vm13, %vm822_vm12 }
 0x1ff   : > { %v817_v54 = vmul.f32 %v1020_v49, %v816_v53 }
 0x201   : > { %v818_v43 = vmul.f32 0.5, %v817_v54 }
 0x203   : > { %v819_v45 = vsub.f32 1.5, %v818_v43 }
 0x205   : > { %v820_v55 = vmul.f32 %v1020_v49, %v819_v45 }
 0x207   : > { %v824_v36 = vsel %vm823_vm14, %v1020_v49, %v820_v55 }
 0x208   : > { %834 = vperm.xlu2 %1007, %v824_v36  }
 0x210   : > { %576 = vperm.xlu2 %1007, %v295_v38  }
 0x22d   : > { %v558_v40 = vpop.permute.xlu2 %557 }
 0x22e   : > { %v560_v44 = vsub.f32 %v1318_v11, %v558_v40  ;;  %v561_v17 = vsub.f32 %v1320_v35, %v558_v40 }
 0x25d   : > { %v565_v56 = vpop.permute.xlu0 %564 }
 0x25e   : > { %v567_v57 = vmul.f32 %v565_v56, %v560_v44  ;;  %v568_v21 = vmul.f32 %v565_v56, %v561_v17 }
 0x260   : > { %600 = vmatpush.msrb.mxu2 %v567_v57  ;;  %623 = vmatpush.msrb.mxu3 %v568_v21 }
 0x261   : > { %961 = vmatmul.msk.f32.vlgmr.msrb.gmra.mxu2 %vm498_vm8, %v292_v22  ;;  %963 = vmatmul.msk.f32.vlgmr.msrb.gmra.mxu3 %vm498_vm8, %v292_v22 }
 0x262   : > { %v828_v59 = vpop.permute.xlu1 %827  ;;  %v835_v11 = vpop.permute.xlu2 %834 }
 0x263   : > { %v830_v30 = vsub.f32 %v1368_v58, %v828_v59  ;;  %v831_v0 = vsub.f32 %v1370_v7, %v828_v59 }
 0x265   : > { %v837_v35 = vmul.f32 %v835_v11, %v830_v30  ;;  %v838_v1 = vmul.f32 %v835_v11, %v831_v0 }
 0x267   : > { %854 = vmatpush.msrb.mxu0 %v837_v35  ;;  %877 = vmatpush.msrb.mxu1 %v838_v1 }
 0x268   : > { %969 = vmatmul.msk.f32.vlgmr.msrb.gmra.mxu0 %vm498_vm8, %v292_v22  ;;  %971 = vmatmul.msk.f32.vlgmr.msrb.gmra.mxu1 %vm498_vm8, %v292_v22 }
 0x269   : > { %962 = vmatmul.msk.f32.gmra.mxu2 %vm498_vm8, %v293_v2  ;;  %964 = vmatmul.msk.f32.gmra.mxu3 %vm498_vm8, %v293_v2 }
 0x26a   : > { %v572_v39 = vpop.permute.xlu1 %571  ;;  %v577_v4 = vpop.permute.xlu2 %576 }
 0x270   : > { %970 = vmatmul.msk.f32.gmra.mxu0 %vm498_vm8, %v293_v2  ;;  %972 = vmatmul.msk.f32.gmra.mxu1 %vm498_vm8, %v293_v2 }
 0x2e4   : > { %v602_v61 = vpop.f32.mrf.mxu2  ;;  %v625_v31 = vpop.f32.mrf.mxu3 }
 0x2e5   : > { %v856_v60 = vpop.f32.mrf.mxu0  ;;  %v879_v3 = vpop.f32.mrf.mxu1  ;;  %v603_v8 = vadd.f32 %v602_v61, %v572_v39  ;;  %v626_v34 = vadd.f32 %v625_v31, %v572_v39 }
 0x2e6   : > { %v857_v12 = vadd.f32 %v856_v60, %v572_v39  ;;  %v880_v52 = vadd.f32 %v879_v3, %v572_v39 }
 0x2e7   : > { %631 = vst [vmem:[%s285_s16] sm:$0xff] %v603_v8 }
 0x2e8   : > { %632 = vst [vmem:[%s285_s16 + $0x8] sm:$0xff] %v626_v34 }
 0x2e9   : > { %973 = vst [vmem:[%s285_s16 + $0x20] sm:$0xff] %v857_v12 }
 0x2ea   : > { %974 = vst [vmem:[%s285_s16 + $0x28] sm:$0xff] %v880_v52 }
 0x2ec   : > { %v605_v6 = vpop.f32.mrf.mxu2  ;;  %v628_v58 = vpop.f32.mrf.mxu3 }
 0x2ed   : > { %v859_v5 = vpop.f32.mrf.mxu0  ;;  %v882_v51 = vpop.f32.mrf.mxu1  ;;  %v606_v7 = vadd.f32 %v605_v6, %v577_v4  ;;  %v629_v9 = vadd.f32 %v628_v58, %v577_v4 }
 0x2ee   : > { %v860_v41 = vadd.f32 %v859_v5, %v577_v4  ;;  %v883_v42 = vadd.f32 %v882_v51, %v577_v4 }
 0x2ef   : > { %633 = vst [vmem:[%s285_s16 + $0x10] sm:$0xff] %v606_v7 }
 0x2f0   : > { %634 = vst [vmem:[%s285_s16 + $0x18] sm:$0xff] %v629_v9 }
 0x2f1   : > { %975 = vst [vmem:[%s285_s16 + $0x30] sm:$0xff] %v860_v41 }
 0x2f2   : > { %976 = vst [vmem:[%s285_s16 + $0x38] sm:$0xff] %v883_v42 }
 0x2f3 PF: > { %s17_s24 = sadd.s32 1, %s1027_s24  }
 0x2f4   : > { %p14_p4 = scmp.ge.s32.totalorder %s17_s24, 4  }
 0x2f6   :  { %16 = sbr.rel (!%p14_p4) target bundleno = 1 (0x1), region = 80 }

</bundles_post_ra>
